<compile_context>
chip_gen: v6e
topology: v6e:2x2x1
jax: 0.10.0
libtpu: 0.0.40
codegen_flags: <defaults>
</compile_context>

<pallas_src>
import jax
import jax.numpy as jnp
from jax.experimental import pallas as pl
from jax.experimental.pallas import tpu as pltpu

HIDDEN = 768                 # fc1/fc2/fc3 output width (roberta-large hidden)
N_OUT = 30                   # final number of labels
N_A, N_B, N_C = 2, 29, 30    # backbone logit widths
K_CAT = N_A + N_B + N_C      # 61
K_PAD = 64                   # padded contraction dim (sublane-friendly)
N_PAD = 128                  # lane-dense padded output width


def _round_up(x, m):
    return ((x + m - 1) // m) * m


# ---------------------------------------------------------------------------
# Pallas kernel: out = tanh(x @ Wf + bf) @ wc2 + bc2   (all fused head math)
# ---------------------------------------------------------------------------
def _combine_kernel(x_ref, wf_ref, bf_ref, wc2_ref, bc2_ref, out_ref):
    z = jnp.tanh(
        jnp.dot(x_ref[...], wf_ref[...],
                preferred_element_type=jnp.float32) + bf_ref[...])
    out = jnp.dot(z, wc2_ref[...],
                  preferred_element_type=jnp.float32) + bc2_ref[...]
    out_ref[...] = out.astype(out_ref.dtype)


# ---------------------------------------------------------------------------
# One-time parameter fusion (host/XLA side, not per call)
# ---------------------------------------------------------------------------
def fuse_params(params):
    """Fold fc1/fc2/fc3 + concat into the first classifier Linear."""
    wc1 = params["wc1"]                      # (2304, 768)
    wc1a = wc1[:HIDDEN]
    wc1b = wc1[HIDDEN:2 * HIDDEN]
    wc1c = wc1[2 * HIDDEN:]
    wf = jnp.concatenate([params["w1"] @ wc1a,
                          params["w2"] @ wc1b,
                          params["w3"] @ wc1c], axis=0)          # (61, 768)
    wf = jnp.pad(wf, ((0, K_PAD - K_CAT), (0, 0)))               # (64, 768)
    bf = (params["b1"] @ wc1a + params["b2"] @ wc1b
          + params["b3"] @ wc1c + params["bc1"])                 # (1, 768)
    wc2p = jnp.pad(params["wc2"], ((0, 0), (0, N_PAD - N_OUT)))  # (768, 128)
    bc2p = jnp.pad(params["bc2"], ((0, 0), (0, N_PAD - N_OUT)))  # (1, 128)
    return (wf.astype(jnp.float32), bf.astype(jnp.float32),
            wc2p.astype(jnp.float32), bc2p.astype(jnp.float32))


# ---------------------------------------------------------------------------
# Wrapper: batch-tiled pallas_call
# ---------------------------------------------------------------------------
def combine_heads(logits_a, logits_b, logits_c, fused, *, tile_b=256):
    wf, bf, wc2p, bc2p = fused
    B = logits_a.shape[0]

    # (B, 61) fused input, padded to lane-friendly (Bp, 64)
    x = jnp.concatenate([logits_a, logits_b, logits_c], axis=-1)
    tile_b = min(tile_b, _round_up(B, 8))
    Bp = _round_up(B, tile_b)
    x = jnp.pad(x.astype(jnp.float32),
                ((0, Bp - B), (0, K_PAD - K_CAT)))

    grid = (pl.cdiv(Bp, tile_b),)

    cost = pl.CostEstimate(
        flops=2 * Bp * (K_PAD * HIDDEN + HIDDEN * N_PAD),
        transcendentals=Bp * HIDDEN,
        bytes_accessed=4 * (Bp * K_PAD + wf.size + bf.size
                            + wc2p.size + bc2p.size + Bp * N_PAD),
    )

    out = pl.pallas_call(
        _combine_kernel,
        out_shape=jax.ShapeDtypeStruct((Bp, N_PAD), jnp.float32),
        grid=grid,
        in_specs=[
            pl.BlockSpec((tile_b, K_PAD), lambda i: (i, 0)),    # activations
            pl.BlockSpec((K_PAD, HIDDEN), lambda i: (0, 0)),    # Wf (resident)
            pl.BlockSpec((1, HIDDEN), lambda i: (0, 0)),        # bf (resident)
            pl.BlockSpec((HIDDEN, N_PAD), lambda i: (0, 0)),    # wc2 (resident)
            pl.BlockSpec((1, N_PAD), lambda i: (0, 0)),         # bc2 (resident)
        ],
        out_specs=pl.BlockSpec((tile_b, N_PAD), lambda i: (i, 0)),
        compiler_params=pltpu.CompilerParams(
            dimension_semantics=("parallel",)),
        cost_estimate=cost,
    )(x, wf, bf, wc2p, bc2p)

    return out[:B, :N_OUT]


# ---------------------------------------------------------------------------
# Synthetic backbone stand-ins (plain JAX glue)
# TODO(synk): the pretrained klue/roberta-large backbones cannot be reproduced
# here; replaced with deterministic embed + masked mean pool + linear
# surrogates producing logits of the same shapes (B,2)/(B,29)/(B,30).
# ---------------------------------------------------------------------------
def synth_backbone_logits(input_ids, attention_mask, emb, wh, bh):
    x = emb[input_ids]                                   # (B, S, H)
    m = attention_mask.astype(jnp.float32)[..., None]    # (B, S, 1)
    pooled = (x * m).sum(axis=1) / jnp.maximum(m.sum(axis=1), 1.0)  # (B, H)
    return pooled @ wh + bh                              # (B, num_labels)


def make_params(key):
    """Deterministic parameter init (shapes match SplitModels.__init__)."""
    ks = jax.random.split(key, 16)
    s = 0.02
    p = {
        # fc1: Linear(2, 768), fc2: Linear(29, 768), fc3: Linear(30, 768)
        "w1": jax.random.normal(ks[0], (N_A, HIDDEN), jnp.float32) * s,
        "b1": jax.random.normal(ks[1], (1, HIDDEN), jnp.float32) * s,
        "w2": jax.random.normal(ks[2], (N_B, HIDDEN), jnp.float32) * s,
        "b2": jax.random.normal(ks[3], (1, HIDDEN), jnp.float32) * s,
        "w3": jax.random.normal(ks[4], (N_C, HIDDEN), jnp.float32) * s,
        "b3": jax.random.normal(ks[5], (1, HIDDEN), jnp.float32) * s,
        # classifier: Linear(2304, 768), Linear(768, 30)
        "wc1": jax.random.normal(ks[6], (3 * HIDDEN, HIDDEN), jnp.float32) * s,
        "bc1": jax.random.normal(ks[7], (1, HIDDEN), jnp.float32) * s,
        "wc2": jax.random.normal(ks[8], (HIDDEN, N_OUT), jnp.float32) * s,
        "bc2": jax.random.normal(ks[9], (1, N_OUT), jnp.float32) * s,
    }
    return p, ks[10:]


def make_backbones(keys, vocab, h):
    """Three surrogate backbones with distinct deterministic weights."""
    backbones = []
    for i, n_labels in enumerate((N_A, N_B, N_C)):
        k0, k1, k2 = jax.random.split(jax.random.fold_in(keys[i], i), 3)
        emb = jax.random.normal(k0, (vocab, h), jnp.float32) * 0.1
        wh = jax.random.normal(k1, (h, n_labels), jnp.float32) * 0.1
        bh = jax.random.normal(k2, (1, n_labels), jnp.float32) * 0.1
        backbones.append((emb, wh, bh))
    return backbones


def split_models_forward(input_ids, attention_mask, fused_params, backbones):
    logits_a = synth_backbone_logits(input_ids, attention_mask, *backbones[0])
    logits_b = synth_backbone_logits(input_ids, attention_mask, *backbones[1])
    logits_c = synth_backbone_logits(input_ids, attention_mask, *backbones[2])
    return combine_heads(logits_a, logits_b, logits_c, fused_params)


if __name__ == "__main__":
    key = jax.random.PRNGKey(0)
    kp, kd = jax.random.split(key)

    params, bkeys = make_params(kp)
    backbones = make_backbones(bkeys, vocab=100, h=32)
    fused = fuse_params(params)

    B, S = 8, 8
    ki, km = jax.random.split(kd)
    input_ids = jax.random.randint(ki, (B, S), 0, 100, dtype=jnp.int32)
    attention_mask = (jax.random.uniform(km, (B, S)) > 0.2).astype(jnp.int32)

    out = split_models_forward(input_ids, attention_mask, fused, backbones)
    out = jax.block_until_ready(out)
    assert out.shape == (B, N_OUT) and out.dtype == jnp.float32

    # sanity check against the plain-JAX UNFUSED reference (original math)
    la = synth_backbone_logits(input_ids, attention_mask, *backbones[0])
    lb = synth_backbone_logits(input_ids, attention_mask, *backbones[1])
    lc = synth_backbone_logits(input_ids, attention_mask, *backbones[2])
    cat = jnp.concatenate([la @ params["w1"] + params["b1"],
                           lb @ params["w2"] + params["b2"],
                           lc @ params["w3"] + params["b3"]], axis=-1)
    ref = (jnp.tanh(cat @ params["wc1"] + params["bc1"]) @ params["wc2"]
           + params["bc2"])
    assert jnp.allclose(out, ref, atol=1e-3, rtol=1e-3), (
        float(jnp.max(jnp.abs(out - ref))))

    print("KERNEL_OK")
</pallas_src>

<mosaic_0001>
module attributes {stable_mosaic.version = 11 : i64} {
  func.func @_combine_kernel(%arg0: i32, %arg1: memref<8x64xf32, #tpu.memory_space<vmem>>, %arg2: memref<64x768xf32, #tpu.memory_space<vmem>>, %arg3: memref<1x768xf32, #tpu.memory_space<vmem>>, %arg4: memref<768x128xf32, #tpu.memory_space<vmem>>, %arg5: memref<1x128xf32, #tpu.memory_space<vmem>>, %arg6: memref<8x128xf32, #tpu.memory_space<vmem>>) attributes {dimension_semantics = [#tpu.dimension_semantics<parallel>], iteration_bounds = array<i64: 1>, scalar_prefetch = 0 : i64, scratch_operands = 0 : i64, tpu.core_type = #tpu.core_type<tc>, window_params = [{transform_indices = @transform_0, window_bounds = array<i64: 8, 64>}, {pipeline_mode = #tpu.pipeline_mode<synchronous>, transform_indices = @transform_1, window_bounds = array<i64: 64, 768>}, {pipeline_mode = #tpu.pipeline_mode<synchronous>, transform_indices = @transform_2, window_bounds = array<i64: 1, 768>}, {pipeline_mode = #tpu.pipeline_mode<synchronous>, transform_indices = @transform_3, window_bounds = array<i64: 768, 128>}, {pipeline_mode = #tpu.pipeline_mode<synchronous>, transform_indices = @transform_4, window_bounds = array<i64: 1, 128>}, {transform_indices = @transform_5, window_bounds = array<i64: 8, 128>}]} {
    %c0 = arith.constant 0 : index
    %c0_0 = arith.constant 0 : index
    %0 = vector.load %arg1[%c0, %c0_0] : memref<8x64xf32, #tpu.memory_space<vmem>>, vector<8x64xf32>
    %c0_1 = arith.constant 0 : index
    %c0_2 = arith.constant 0 : index
    %1 = vector.load %arg2[%c0_1, %c0_2] : memref<64x768xf32, #tpu.memory_space<vmem>>, vector<64x768xf32>
    %cst = arith.constant dense<0.000000e+00> : vector<8x768xf32>
    %2 = tpu.matmul %0, %1, %cst {dimension_numbers = #tpu.dot_dimension_numbers<[1], [0], [0], [1], [0, 0, 1, 1], [], []>} : vector<8x64xf32>, vector<64x768xf32>, vector<8x768xf32> -> vector<8x768xf32>
    %c0_3 = arith.constant 0 : index
    %c0_4 = arith.constant 0 : index
    %3 = vector.load %arg3[%c0_3, %c0_4] : memref<1x768xf32, #tpu.memory_space<vmem>>, vector<1x768xf32>
    %4 = vector.broadcast %3 : vector<1x768xf32> to vector<8x768xf32>
    %5 = arith.addf %2, %4 : vector<8x768xf32>
    %6 = math.tanh %5 : vector<8x768xf32>
    %c0_5 = arith.constant 0 : index
    %c0_6 = arith.constant 0 : index
    %7 = vector.load %arg4[%c0_5, %c0_6] : memref<768x128xf32, #tpu.memory_space<vmem>>, vector<768x128xf32>
    %cst_7 = arith.constant dense<0.000000e+00> : vector<8x128xf32>
    %8 = tpu.matmul %6, %7, %cst_7 {dimension_numbers = #tpu.dot_dimension_numbers<[1], [0], [0], [1], [0, 0, 1, 1], [], []>} : vector<8x768xf32>, vector<768x128xf32>, vector<8x128xf32> -> vector<8x128xf32>
    %c0_8 = arith.constant 0 : index
    %c0_9 = arith.constant 0 : index
    %9 = vector.load %arg5[%c0_8, %c0_9] : memref<1x128xf32, #tpu.memory_space<vmem>>, vector<1x128xf32>
    %10 = vector.broadcast %9 : vector<1x128xf32> to vector<8x128xf32>
    %11 = arith.addf %8, %10 : vector<8x128xf32>
    %c0_10 = arith.constant 0 : index
    %c0_11 = arith.constant 0 : index
    %12 = vector.load %arg6[%c0_10, %c0_11] : memref<8x128xf32, #tpu.memory_space<vmem>>, vector<8x128xf32>
    tpu.vector_store %arg6[%c0_10, %c0_11], %11 {strides = array<i32>} : memref<8x128xf32, #tpu.memory_space<vmem>>, vector<8x128xf32>,
    return
  }
  func.func @transform_0(%arg0: i32) -> (i32, i32) {
    %c0_i32 = arith.constant 0 : i32
    %c0_i32_0 = arith.constant 0 : i32
    return %arg0, %c0_i32 : i32, i32
  }
  func.func @transform_1(%arg0: i32) -> (i32, i32) {
    %c0_i32 = arith.constant 0 : i32
    %c0_i32_0 = arith.constant 0 : i32
    %c0_i32_1 = arith.constant 0 : i32
    return %c0_i32, %c0_i32_0 : i32, i32
  }
  func.func @transform_2(%arg0: i32) -> (i32, i32) {
    %c0_i32 = arith.constant 0 : i32
    %c0_i32_0 = arith.constant 0 : i32
    %c0_i32_1 = arith.constant 0 : i32
    return %c0_i32, %c0_i32_0 : i32, i32
  }
  func.func @transform_3(%arg0: i32) -> (i32, i32) {
    %c0_i32 = arith.constant 0 : i32
    %c0_i32_0 = arith.constant 0 : i32
    %c0_i32_1 = arith.constant 0 : i32
    return %c0_i32, %c0_i32_0 : i32, i32
  }
  func.func @transform_4(%arg0: i32) -> (i32, i32) {
    %c0_i32 = arith.constant 0 : i32
    %c0_i32_0 = arith.constant 0 : i32
    %c0_i32_1 = arith.constant 0 : i32
    return %c0_i32, %c0_i32_0 : i32, i32
  }
  func.func @transform_5(%arg0: i32) -> (i32, i32) {
    %c0_i32 = arith.constant 0 : i32
    %c0_i32_0 = arith.constant 0 : i32
    return %arg0, %c0_i32 : i32, i32
  }
}

</mosaic_0001>

<bundles_post_ra>
// kernel: tpu_custom_call.1
= control target key start
LH: loop header
LB: loop body
LE: loop exit
PB: predicated region body
PF: predicated region fallthrough
CT: control target
= control target key end

     0   :  { %10 = vsyncpa [#allocation3], 0  ;;  %s1015_s0 = inlined_call_operand.hbm [shape: f32[8,64], index: 0, kind: input, shape index: {}]   ;;  %s1016_s1 = inlined_call_operand.hbm [shape: f32[64,768], index: 1, kind: input, shape index: {}]   ;;  %s1017_s2 = inlined_call_operand.hbm [shape: f32[1,768], index: 2, kind: input, shape index: {}]   ;;  %s1018_s3 = inlined_call_operand.hbm [shape: f32[768,128], index: 3, kind: input, shape index: {}]   ;;  %s1019_s4 = inlined_call_operand.vmem [shape: f32[1,128], index: 4, kind: input, shape index: {}]   ;;  %s1020_s5 = inlined_call_operand.hbm [shape: f32[8,128], index: 5, kind: output, shape index: {}]  }
   0x1   :  { %11 = vsyncpa [#allocation6], 0 }
   0x2   :  { %12 = vsyncpa [#allocation9], 0 }
   0x3   :  { %13 = vsyncpa [#allocation4], 0  ;;  %s946_s18 = smov [#allocation5]  }
   0x4   :  { %s29_s19 = sshll.u32 %s946_s18, 4  ;;  %s30_s19 = int_to_ptr.vmem [resolvable:$true] %s29_s19 }
   0x5   :  { %s846_s20 = scalar_lea.vmem %s30_s19, 6144  ;;  %p851_p1 = scmp.lt.s32.totalorder %s30_s19, %s30_s19 }
   0x6   :  { %p847_p0 = scmp.ne.s32.totalorder %s30_s19, %s846_s20  ;;  %p852_p2 = scmp.lt.s32.totalorder %s846_s20, %s846_s20 }
   0x8   :  { %p853_p3 = por %p852_p2, %p851_p1 }
   0xa   :  { %p854_p4 = pnand %p853_p3, %p847_p0 }
   0xc   :  { %857 = shalt.err (!%p854_p4)
}
   0xd   :  { %s947_s21 = smov 768   ;;  %s948_s22 = smov 48  }
   0xe   :  { %35 = dma.hbm_to_vmem [thread:$0]  %s1016_s1, 6144, %s30_s19, [#allocation6], %s947_s21, %s947_s21, %s948_s22  }
   0xf   :  { %s949_s25 = smov [#allocation2]   ;;  %s950_s27 = smov [#allocation7]  }
  0x10   :  { %s20_s26 = sshll.u32 %s949_s25, 4  ;;  %s42_s28 = sshll.u32 %s950_s27, 4  ;;  %s21_s26 = int_to_ptr.vmem [resolvable:$true] %s20_s26  ;;  %s43_s28 = int_to_ptr.vmem [resolvable:$true] %s42_s28 }
  0x11   :  { %s866_s29 = scalar_lea.vmem %s21_s26, 128  ;;  %p871_p6 = scmp.lt.s32.totalorder %s21_s26, %s21_s26 }
  0x12   :  { %p867_p5 = scmp.ne.s32.totalorder %s21_s26, %s866_s29  ;;  %p872_p7 = scmp.lt.s32.totalorder %s866_s29, %s866_s29 }
  0x14   :  { %p873_p8 = por %p872_p7, %p871_p6 }
  0x16   :  { %p874_p9 = pnand %p873_p8, %p867_p5 }
  0x18   :  { %877 = shalt.err (!%p874_p9)
}
  0x19   :  { %23 = dma.hbm_to_vmem [thread:$0]  %s1015_s0, 128, %s21_s26, [#allocation3]  }
  0x1a   :  { %s886_s7 = scalar_lea.vmem %s43_s28, 96  ;;  %p891_p11 = scmp.lt.s32.totalorder %s43_s28, %s43_s28 }
  0x1b   :  { %p887_p10 = scmp.ne.s32.totalorder %s43_s28, %s886_s7  ;;  %p892_p12 = scmp.lt.s32.totalorder %s886_s7, %s886_s7 }
  0x1d   :  { %p893_p13 = por %p892_p12, %p891_p11 }
  0x1f   :  { %p894_p0 = pnand %p893_p13, %p887_p10 }
  0x21   :  { %897 = shalt.err (!%p894_p0)
}
  0x22   :  { %45 = dma.hbm_to_vmem [thread:$0]  %s1017_s2, 96, %s43_s28, [#allocation6]  }
  0x23   :  { %s951_s9 = smov [#allocation8]  }
  0x24   :  { %s51_s10 = sshll.u32 %s951_s9, 4  ;;  %s52_s10 = int_to_ptr.vmem [resolvable:$true] %s51_s10 }
  0x25   :  { %s906_s11 = scalar_lea.vmem %s52_s10, 12288  ;;  %p911_p2 = scmp.lt.s32.totalorder %s52_s10, %s52_s10 }
  0x26   :  { %p907_p1 = scmp.ne.s32.totalorder %s52_s10, %s906_s11  ;;  %p912_p3 = scmp.lt.s32.totalorder %s906_s11, %s906_s11 }
  0x28   :  { %p913_p4 = por %p912_p3, %p911_p2 }
  0x2a   :  { %p914_p5 = pnand %p913_p4, %p907_p1 }
  0x2c   :  { %917 = shalt.err (!%p914_p5)
}
  0x2d   :  { %s952_s0 = smov 128   ;;  %s953_s12 = smov 8  }
  0x2e   :  { %57 = dma.hbm_to_vmem [thread:$0]  %s1018_s3, 12288, %s52_s10, [#allocation9], %s952_s0, %s952_s0, %s953_s12  }
  0x2f   :  { %938 = dma.done.wait [#allocation3], 128  }
  0x30   :  { %939 = vsyncadd [#allocation3], 4294967168 }
  0x31   :  { %940 = dma.done.wait [#allocation6], 6240  }
  0x32   :  { %941 = vsyncadd [#allocation6], 4294961056 }
  0x33   :  { %942 = dma.done.wait [#allocation9], 12288  }
  0x34   :  { %943 = vsyncadd [#allocation9], 4294955008  ;;  %v954_v0 = vmov 0.0   ;;  %v116_v1 = vld [vmem:[#allocation5 + $0x158] sm:$0xff]  ;;  %v115_v2 = vld [vmem:[#allocation5 + $0x150] sm:$0xff]  ;;  %vm153_vm0 = vcmask 523264  }
  0x35   :  { %221 = vmatprep.mubr.f32.mxu0 %v954_v0  ;;  %292 = vmatprep.mubr.f32.mxu1 %v954_v0  ;;  %v110_v3 = vld [vmem:[#allocation5 + $0x128] sm:$0xff]  ;;  %v109_v5 = vld [vmem:[#allocation5 + $0x120] sm:$0xff]  ;;  %v104_v7 = vld [vmem:[#allocation5 + $0xf8] sm:$0xff]  ;;  %s955_s15 = smov [#allocation10]  }
  0x36   :  { %173 = vmatprep.subr.mxu0 %v116_v1  ;;  %v118_v4 = vld [vmem:[#allocation5 + $0x168] sm:$0xff]  ;;  %v117_v6 = vld [vmem:[#allocation5 + $0x160] sm:$0xff]  ;;  %v112_v8 = vld [vmem:[#allocation5 + $0x138] sm:$0xff]  ;;  %s696_s16 = sshll.u32 %s955_s15, 4  ;;  %s697_s16 = int_to_ptr.vmem [resolvable:$true] %s696_s16 }
  0x37   :  { %174 = vmatpush1.msra.mxu0 %v115_v2  ;;  %244 = vmatprep.subr.mxu1 %v118_v4  ;;  %v103_v9 = vld [vmem:[#allocation5 + $0xf0] sm:$0xff]  ;;  %v106_v11 = vld [vmem:[#allocation5 + $0x108] sm:$0xff]  ;;  %v105_v13 = vld [vmem:[#allocation5 + $0x100] sm:$0xff]  ;;  %s918_s17 = scalar_lea.vmem %s697_s16, 128  ;;  %p923_p7 = scmp.lt.s32.totalorder %s697_s16, %s697_s16 }
  0x38   :  { %175 = vmatprep.subr.mxu0 %v110_v3  ;;  %245 = vmatpush1.msra.mxu1 %v117_v6  ;;  %v111_v10 = vld [vmem:[#allocation5 + $0x130] sm:$0xff]  ;;  %v98_v12 = vld [vmem:[#allocation5 + $0xc8] sm:$0xff]  ;;  %v97_v14 = vld [vmem:[#allocation5 + $0xc0] sm:$0xff]  ;;  %p919_p6 = scmp.ne.s32.totalorder %s697_s16, %s918_s17  ;;  %p924_p8 = scmp.lt.s32.totalorder %s918_s17, %s918_s17 }
  0x39   :  { %176 = vmatpush1.msra.mxu0 %v109_v5  ;;  %246 = vmatprep.subr.mxu1 %v112_v8  ;;  %v100_v15 = vld [vmem:[#allocation5 + $0xd8] sm:$0xff]  ;;  %v99_v17 = vld [vmem:[#allocation5 + $0xd0] sm:$0xff]  ;;  %v94_v19 = vld [vmem:[#allocation5 + $0xa8] sm:$0xff] }
  0x3a   :  { %177 = vmatprep.subr.mxu0 %v104_v7  ;;  %247 = vmatpush1.msra.mxu1 %v111_v10  ;;  %v92_v16 = vld [vmem:[#allocation5 + $0x98] sm:$0xff]  ;;  %v91_v18 = vld [vmem:[#allocation5 + $0x90] sm:$0xff]  ;;  %v86_v20 = vld [vmem:[#allocation5 + $0x68] sm:$0xff]  ;;  %p925_p9 = por %p924_p8, %p923_p7 }
  0x3b   :  { %178 = vmatpush1.msra.mxu0 %v103_v9  ;;  %248 = vmatprep.subr.mxu1 %v106_v11  ;;  %v93_v21 = vld [vmem:[#allocation5 + $0xa0] sm:$0xff]  ;;  %v88_v23 = vld [vmem:[#allocation5 + $0x78] sm:$0xff]  ;;  %v87_v25 = vld [vmem:[#allocation5 + $0x70] sm:$0xff] }
  0x3c   :  { %179 = vmatprep.subr.mxu0 %v98_v12  ;;  %249 = vmatpush1.msra.mxu1 %v105_v13  ;;  %v85_v22 = vld [vmem:[#allocation5 + $0x60] sm:$0xff]  ;;  %v80_v24 = vld [vmem:[#allocation5 + $0x38] sm:$0xff]  ;;  %v79_v26 = vld [vmem:[#allocation5 + $0x30] sm:$0xff]  ;;  %p926_p10 = pnand %p925_p9, %p919_p6 }
  0x3d   :  { %180 = vmatpush1.msra.mxu0 %v97_v14  ;;  %250 = vmatprep.subr.mxu1 %v100_v15  ;;  %v82_v27 = vld [vmem:[#allocation5 + $0x48] sm:$0xff]  ;;  %v81_v29 = vld [vmem:[#allocation5 + $0x40] sm:$0xff]  ;;  %v76_v31 = vld [vmem:[#allocation5 + $0x18] sm:$0xff] }
  0x3e   :  { %181 = vmatprep.subr.mxu0 %v92_v16  ;;  %251 = vmatpush1.msra.mxu1 %v99_v17  ;;  %v74_v28 = vld [vmem:[#allocation5 + $0x8] sm:$0xff]  ;;  %v73_v30 = vld [vmem:[#allocation5] sm:$0xff]  ;;  %v1000_v32 = vld [vmem:[#allocation2] sm:$0xff] }
  0x3f   :  { %182 = vmatpush1.msra.mxu0 %v91_v18  ;;  %252 = vmatprep.subr.mxu1 %v94_v19  ;;  %v75_v33 = vld [vmem:[#allocation5 + $0x10] sm:$0xff]  ;;  %v120_v34 = vld [vmem:[#allocation5 + $0x178] sm:$0xff]  ;;  %v114_v36 = vld [vmem:[#allocation5 + $0x148] sm:$0xff] }
  0x40   :  { %183 = vmatprep.subr.mxu0 %v86_v20  ;;  %253 = vmatpush1.msra.mxu1 %v93_v21  ;;  %v119_v35 = vld [vmem:[#allocation5 + $0x170] sm:$0xff]  ;;  %v407_v37 = vld [vmem:[#allocation8 + $0xf8] sm:$0xff]  ;;  %v102_v44 = vld [vmem:[#allocation5 + $0xe8] sm:$0xff] }
  0x41   :  { %184 = vmatpush1.msra.mxu0 %v85_v22  ;;  %254 = vmatprep.subr.mxu1 %v88_v23  ;;  %v113_v38 = vld [vmem:[#allocation5 + $0x140] sm:$0xff]  ;;  %v108_v40 = vld [vmem:[#allocation5 + $0x118] sm:$0xff]  ;;  %v107_v42 = vld [vmem:[#allocation5 + $0x110] sm:$0xff] }
  0x42   :  { %185 = vmatprep.subr.mxu0 %v80_v24  ;;  %255 = vmatpush1.msra.mxu1 %v87_v25  ;;  %v391_v39 = vld [vmem:[#allocation8 + $0x78] sm:$0xff]  ;;  %v406_v41 = vld [vmem:[#allocation8 + $0xf0] sm:$0xff]  ;;  %v405_v45 = vld [vmem:[#allocation8 + $0xe8] sm:$0xff] }
  0x43   :  { %186 = vmatpush1.msra.mxu0 %v79_v26  ;;  %256 = vmatprep.subr.mxu1 %v82_v27  ;;  %v390_v43 = vld [vmem:[#allocation8 + $0x70] sm:$0xff]  ;;  %v101_v46 = vld [vmem:[#allocation5 + $0xe0] sm:$0xff]  ;;  %v389_v47 = vld [vmem:[#allocation8 + $0x68] sm:$0xff] }
  0x44   :  { %187 = vmatprep.subr.mxu0 %v74_v28  ;;  %257 = vmatpush1.msra.mxu1 %v81_v29  ;;  %v96_v48 = vld [vmem:[#allocation5 + $0xb8] sm:$0xff]  ;;  %v404_v49 = vld [vmem:[#allocation8 + $0xe0] sm:$0xff]  ;;  %v95_v50 = vld [vmem:[#allocation5 + $0xb0] sm:$0xff] }
  0x45   :  { %188 = vmatpush1.msra.mxu0 %v73_v30  ;;  %258 = vmatprep.subr.mxu1 %v76_v31  ;;  %v388_v51 = vld [vmem:[#allocation8 + $0x60] sm:$0xff]  ;;  %v403_v53 = vld [vmem:[#allocation8 + $0xd8] sm:$0xff]  ;;  %v402_v57 = vld [vmem:[#allocation8 + $0xd0] sm:$0xff] }
  0x46   :  { %707 = vmatmul.mubr.msk.f32.vlgmr.msra.gmra.mxu0 %vm153_vm0, %v1000_v32  ;;  %259 = vmatpush1.msra.mxu1 %v75_v33  ;;  %v90_v52 = vld [vmem:[#allocation5 + $0x88] sm:$0xff]  ;;  %v89_v54 = vld [vmem:[#allocation5 + $0x80] sm:$0xff]  ;;  %v84_v56 = vld [vmem:[#allocation5 + $0x58] sm:$0xff] }
  0x47   :  { %708 = vmatmul.mubr.msk.f32.vlgmr.msra.gmra.mxu1 %vm153_vm0, %v1000_v32  ;;  %315 = vmatprep.subr.mxu0 %v120_v34  ;;  %v387_v55 = vld [vmem:[#allocation8 + $0x58] sm:$0xff]  ;;  %v83_v58 = vld [vmem:[#allocation5 + $0x50] sm:$0xff]  ;;  %v78_v60 = vld [vmem:[#allocation5 + $0x28] sm:$0xff] }
  0x48   :  { %316 = vmatpush1.msra.mxu0 %v119_v35  ;;  %363 = vmatprep.mubr.f32.mxu0 %v954_v0  ;;  %v386_v59 = vld [vmem:[#allocation8 + $0x50] sm:$0xff]  ;;  %v401_v61 = vld [vmem:[#allocation8 + $0xc8] sm:$0xff]  ;;  %v77_v62 = vld [vmem:[#allocation5 + $0x20] sm:$0xff] }
  0x49   :  { %317 = vmatprep.subr.mxu0 %v114_v36  ;;  %711 = vmatprep.subr.mxu1 %v407_v37  ;;  %v439_v63 = vld [vmem:[#allocation8 + $0x1f8] sm:$0xff]  ;;  %v438_v1 = vld [vmem:[#allocation8 + $0x1f0] sm:$0xff]  ;;  %v437_v3 = vld [vmem:[#allocation8 + $0x1e8] sm:$0xff] }
  0x4a   :  { %318 = vmatpush1.msra.mxu0 %v113_v38  ;;  %712 = vmatpush3.msra.mxu1 %v391_v39  ;;  %v423_v0 = vld [vmem:[#allocation8 + $0x178] sm:$0xff]  ;;  %v422_v2 = vld [vmem:[#allocation8 + $0x170] sm:$0xff]  ;;  %v421_v4 = vld [vmem:[#allocation8 + $0x168] sm:$0xff] }
  0x4b   :  { %319 = vmatprep.subr.mxu0 %v108_v40  ;;  %713 = vmatprep.subr.mxu1 %v406_v41  ;;  %v436_v5 = vld [vmem:[#allocation8 + $0x1e0] sm:$0xff]  ;;  %v435_v7 = vld [vmem:[#allocation8 + $0x1d8] sm:$0xff]  ;;  %v385_v9 = vld [vmem:[#allocation8 + $0x48] sm:$0xff] }
  0x4c   :  { %320 = vmatpush1.msra.mxu0 %v107_v42  ;;  %714 = vmatpush3.msra.mxu1 %v390_v43  ;;  %v420_v6 = vld [vmem:[#allocation8 + $0x160] sm:$0xff]  ;;  %v419_v8 = vld [vmem:[#allocation8 + $0x158] sm:$0xff]  ;;  %v434_v10 = vld [vmem:[#allocation8 + $0x1d0] sm:$0xff] }
  0x4d   :  { %321 = vmatprep.subr.mxu0 %v102_v44  ;;  %715 = vmatprep.subr.mxu1 %v405_v45  ;;  %v400_v11 = vld [vmem:[#allocation8 + $0xc0] sm:$0xff]  ;;  %v418_v12 = vld [vmem:[#allocation8 + $0x150] sm:$0xff]  ;;  %v433_v14 = vld [vmem:[#allocation8 + $0x1c8] sm:$0xff] }
  0x4e   :  { %322 = vmatpush1.msra.mxu0 %v101_v46  ;;  %716 = vmatpush3.msra.mxu1 %v389_v47  ;;  %v384_v13 = vld [vmem:[#allocation8 + $0x40] sm:$0xff]  ;;  %v399_v15 = vld [vmem:[#allocation8 + $0xb8] sm:$0xff]  ;;  %v417_v16 = vld [vmem:[#allocation8 + $0x148] sm:$0xff] }
  0x4f   :  { %323 = vmatprep.subr.mxu0 %v96_v48  ;;  %717 = vmatprep.subr.mxu1 %v404_v49  ;;  %v383_v17 = vld [vmem:[#allocation8 + $0x38] sm:$0xff]  ;;  %v432_v18 = vld [vmem:[#allocation8 + $0x1c0] sm:$0xff]  ;;  %v398_v19 = vld [vmem:[#allocation8 + $0xb0] sm:$0xff] }
  0x50   :  { %324 = vmatpush1.msra.mxu0 %v95_v50  ;;  %718 = vmatpush3.msra.mxu1 %v388_v51  ;;  %v416_v20 = vld [vmem:[#allocation8 + $0x140] sm:$0xff]  ;;  %v382_v21 = vld [vmem:[#allocation8 + $0x30] sm:$0xff]  ;;  %v431_v22 = vld [vmem:[#allocation8 + $0x1b8] sm:$0xff]  ;;  %v123_v51 = vlaneseq }
  0x51   :  { %325 = vmatprep.subr.mxu0 %v90_v52  ;;  %719 = vmatprep.subr.mxu1 %v403_v53  ;;  %v397_v23 = vld [vmem:[#allocation8 + $0xa8] sm:$0xff]  ;;  %v415_v24 = vld [vmem:[#allocation8 + $0x138] sm:$0xff]  ;;  %v430_v26 = vld [vmem:[#allocation8 + $0x1b0] sm:$0xff] }
  0x52   :  { %326 = vmatpush1.msra.mxu0 %v89_v54  ;;  %720 = vmatpush3.msra.mxu1 %v387_v55  ;;  %v381_v25 = vld [vmem:[#allocation8 + $0x28] sm:$0xff]  ;;  %v396_v27 = vld [vmem:[#allocation8 + $0xa0] sm:$0xff]  ;;  %v414_v28 = vld [vmem:[#allocation8 + $0x130] sm:$0xff]  ;;  %v124_v52 = vshrl.u32 %v123_v51, 7 }
  0x53   :  { %327 = vmatprep.subr.mxu0 %v84_v56  ;;  %721 = vmatprep.subr.mxu1 %v402_v57  ;;  %v380_v29 = vld [vmem:[#allocation8 + $0x20] sm:$0xff]  ;;  %v429_v30 = vld [vmem:[#allocation8 + $0x1a8] sm:$0xff]  ;;  %v395_v31 = vld [vmem:[#allocation8 + $0x98] sm:$0xff] }
  0x54   :  { %328 = vmatpush1.msra.mxu0 %v83_v58  ;;  %722 = vmatpush3.msra.mxu1 %v386_v59  ;;  %v379_v33 = vld [vmem:[#allocation8 + $0x18] sm:$0xff]  ;;  %v428_v34 = vld [vmem:[#allocation8 + $0x1a0] sm:$0xff]  ;;  %v394_v35 = vld [vmem:[#allocation8 + $0x90] sm:$0xff]  ;;  %v125_v53 = vsub.s32 0, %v124_v52  ;;  %v133_v55 = vsub.s32 2, %v124_v52  ;;  %v129_v56 = vsub.s32 1, %v124_v52 }
  0x55   :  { %329 = vmatprep.subr.mxu0 %v78_v60  ;;  %723 = vmatprep.subr.mxu1 %v401_v61  ;;  %v412_v36 = vld [vmem:[#allocation8 + $0x120] sm:$0xff]  ;;  %v378_v37 = vld [vmem:[#allocation8 + $0x10] sm:$0xff]  ;;  %v427_v38 = vld [vmem:[#allocation8 + $0x198] sm:$0xff]  ;;  %v137_v57 = vsub.s32 3, %v124_v52 }
  0x56   :  { %330 = vmatpush1.msra.mxu0 %v77_v62  ;;  %724 = vmatpush3.msra.mxu1 %v385_v9  ;;  %v393_v39 = vld [vmem:[#allocation8 + $0x88] sm:$0xff]  ;;  %v411_v40 = vld [vmem:[#allocation8 + $0x118] sm:$0xff]  ;;  %v426_v42 = vld [vmem:[#allocation8 + $0x190] sm:$0xff] }
  0x57   :  { %709 = vmatmul.mubr.msk.f32.vlgmr.msra.gmra.mxu0 %vm153_vm0, %v1000_v32  ;;  %746 = vmatprep.subr.mxu0 %v439_v63  ;;  %v413_v32 = vld [vmem:[#allocation8 + $0x128] sm:$0xff]  ;;  %v392_v43 = vld [vmem:[#allocation8 + $0x80] sm:$0xff]  ;;  %v410_v44 = vld [vmem:[#allocation8 + $0x110] sm:$0xff] }
  0x58   :  { %747 = vmatpush3.msra.mxu0 %v423_v0  ;;  %725 = vmatprep.subr.mxu1 %v400_v11  ;;  %v377_v41 = vld [vmem:[#allocation8 + $0x8] sm:$0xff]  ;;  %v376_v45 = vld [vmem:[#allocation8] sm:$0xff]  ;;  %v471_v48 = vld [vmem:[#allocation8 + $0x2f8] sm:$0xff] }
  0x59   :  { %748 = vmatprep.subr.mxu0 %v438_v1  ;;  %726 = vmatpush3.msra.mxu1 %v384_v13  ;;  %v425_v46 = vld [vmem:[#allocation8 + $0x188] sm:$0xff]  ;;  %v424_v49 = vld [vmem:[#allocation8 + $0x180] sm:$0xff]  ;;  %v121_v54 = vld [vmem:[#allocation7] sm:$0x3f] }
  0x5a   :  { %749 = vmatpush3.msra.mxu0 %v422_v2  ;;  %727 = vmatprep.subr.mxu1 %v399_v15  ;;  %v409_v47 = vld [vmem:[#allocation8 + $0x108] sm:$0xff]  ;;  %v408_v50 = vld [vmem:[#allocation8 + $0x100] sm:$0xff]  ;;  %v126_v58 = vrot.slane %v121_v54, %v125_v53  ;;  %v134_v59 = vrot.slane %v121_v54, %v133_v55  ;;  %v130_v60 = vrot.slane %v121_v54, %v129_v56  ;;  %v710_v55 = vld [vmem:[%s1019_s4] ss:$0 sm:$0xff] }
  0x5b   :  { %750 = vmatprep.subr.mxu0 %v437_v3  ;;  %728 = vmatpush3.msra.mxu1 %v383_v17  ;;  %v138_v62 = vrot.slane %v121_v54, %v137_v57 }
  0x5c   :  { %751 = vmatpush3.msra.mxu0 %v421_v4  ;;  %729 = vmatprep.subr.mxu1 %v398_v19  ;;  %v453_v19 = vld [vmem:[#allocation8 + $0x268] sm:$0xff] }
  0x5d   :  { %752 = vmatprep.subr.mxu0 %v436_v5  ;;  %730 = vmatpush3.msra.mxu1 %v382_v21  ;;  %v452_v21 = vld [vmem:[#allocation8 + $0x260] sm:$0xff] }
  0x5e   :  { %753 = vmatpush3.msra.mxu0 %v420_v6  ;;  %731 = vmatprep.subr.mxu1 %v397_v23  ;;  %v145_v6 = vsub.s32 5, %v124_v52  ;;  %v451_v23 = vld [vmem:[#allocation8 + $0x258] sm:$0xff] }
  0x5f   :  { %754 = vmatprep.subr.mxu0 %v435_v7  ;;  %732 = vmatpush3.msra.mxu1 %v381_v25  ;;  %v466_v25 = vld [vmem:[#allocation8 + $0x2d0] sm:$0xff] }
  0x60   :  { %755 = vmatpush3.msra.mxu0 %v419_v8  ;;  %733 = vmatprep.subr.mxu1 %v396_v27  ;;  %v146_v8 = vrot.slane %v121_v54, %v145_v6  ;;  %v465_v27 = vld [vmem:[#allocation8 + $0x2c8] sm:$0xff] }
  0x61   :  { %756 = vmatprep.subr.mxu0 %v434_v10  ;;  %734 = vmatpush3.msra.mxu1 %v380_v29  ;;  %v449_v29 = vld [vmem:[#allocation8 + $0x248] sm:$0xff] }
  0x62   :  { %757 = vmatpush3.msra.mxu0 %v418_v12  ;;  %735 = vmatprep.subr.mxu1 %v395_v31  ;;  %v455_v12 = vld [vmem:[#allocation8 + $0x278] sm:$0xff]  ;;  %v448_v31 = vld [vmem:[#allocation8 + $0x240] sm:$0xff] }
  0x63   :  { %758 = vmatprep.subr.mxu0 %v433_v14  ;;  %736 = vmatpush3.msra.mxu1 %v379_v33  ;;  %v470_v14 = vld [vmem:[#allocation8 + $0x2f0] sm:$0xff] }
  0x64   :  { %759 = vmatpush3.msra.mxu0 %v417_v16  ;;  %737 = vmatprep.subr.mxu1 %v394_v35  ;;  %v454_v16 = vld [vmem:[#allocation8 + $0x270] sm:$0xff] }
  0x65   :  { %760 = vmatprep.subr.mxu0 %v432_v18  ;;  %738 = vmatpush3.msra.mxu1 %v378_v37  ;;  %v469_v18 = vld [vmem:[#allocation8 + $0x2e8] sm:$0xff]  ;;  %v446_v37 = vld [vmem:[#allocation8 + $0x230] sm:$0xff] }
  0x66   :  { %761 = vmatpush3.msra.mxu0 %v416_v20  ;;  %739 = vmatprep.subr.mxu1 %v393_v39  ;;  %v468_v20 = vld [vmem:[#allocation8 + $0x2e0] sm:$0xff]  ;;  %v445_v39 = vld [vmem:[#allocation8 + $0x228] sm:$0xff] }
  0x67   :  { %762 = vmatprep.subr.mxu0 %v431_v22  ;;  %740 = vmatpush3.msra.mxu1 %v377_v41  ;;  %v467_v22 = vld [vmem:[#allocation8 + $0x2d8] sm:$0xff]  ;;  %v444_v41 = vld [vmem:[#allocation8 + $0x220] sm:$0xff] }
  0x68   :  { %763 = vmatpush3.msra.mxu0 %v415_v24  ;;  %741 = vmatprep.subr.mxu1 %v392_v43  ;;  %v141_v24 = vsub.s32 4, %v124_v52  ;;  %v443_v43 = vld [vmem:[#allocation8 + $0x218] sm:$0xff] }
  0x69   :  { %764 = vmatprep.subr.mxu0 %v430_v26  ;;  %742 = vmatpush3.msra.mxu1 %v376_v45  ;;  %v450_v26 = vld [vmem:[#allocation8 + $0x250] sm:$0xff] }
  0x6a   :  { %765 = vmatpush3.msra.mxu0 %v414_v28  ;;  %781 = vmatprep.subr.mxu1 %v471_v48  ;;  %v142_v28 = vrot.slane %v121_v54, %v141_v24  ;;  %v442_v45 = vld [vmem:[#allocation8 + $0x210] sm:$0xff]  ;;  %v456_v48 = vld [vmem:[#allocation8 + $0x280] sm:$0xff] }
  0x6b   :  { %766 = vmatprep.subr.mxu0 %v429_v30  ;;  %v464_v30 = vld [vmem:[#allocation8 + $0x2c0] sm:$0xff] }
  0x6c   :  { %767 = vmatpush3.msra.mxu0 %v413_v32  ;;  %v463_v32 = vld [vmem:[#allocation8 + $0x2b8] sm:$0xff] }
  0x6d   :  { %768 = vmatprep.subr.mxu0 %v428_v34  ;;  %v447_v34 = vld [vmem:[#allocation8 + $0x238] sm:$0xff] }
  0x6e   :  { %769 = vmatpush3.msra.mxu0 %v412_v36  ;;  %v462_v36 = vld [vmem:[#allocation8 + $0x2b0] sm:$0xff] }
  0x6f   :  { %770 = vmatprep.subr.mxu0 %v427_v38  ;;  %v461_v38 = vld [vmem:[#allocation8 + $0x2a8] sm:$0xff] }
  0x70   :  { %771 = vmatpush3.msra.mxu0 %v411_v40  ;;  %v460_v40 = vld [vmem:[#allocation8 + $0x2a0] sm:$0xff] }
  0x71   :  { %772 = vmatprep.subr.mxu0 %v426_v42  ;;  %v459_v42 = vld [vmem:[#allocation8 + $0x298] sm:$0xff] }
  0x72   :  { %773 = vmatpush3.msra.mxu0 %v410_v44  ;;  %v458_v44 = vld [vmem:[#allocation8 + $0x290] sm:$0xff] }
  0x73   :  { %774 = vmatprep.subr.mxu0 %v425_v46  ;;  %v457_v46 = vld [vmem:[#allocation8 + $0x288] sm:$0xff] }
  0x74   :  { %775 = vmatpush3.msra.mxu0 %v409_v47  ;;  %v441_v47 = vld [vmem:[#allocation8 + $0x208] sm:$0xff] }
  0x75   :  { %776 = vmatprep.subr.mxu0 %v424_v49  ;;  %v440_v49 = vld [vmem:[#allocation8 + $0x200] sm:$0xff] }
  0x76   :  { %777 = vmatpush3.msra.mxu0 %v408_v50 }
 0x106   :  { %v223_v61 = vpop.f32.mrf.mxu0 }
 0x107   :  { %v224_v63 = vadd.f32 %v223_v61, %v126_v58  ;;  %v294_v0 = vpop.f32.mrf.mxu1 }
 0x108   :  { %v225_v1 = vpop.f32.mrf.mxu0  ;;  %v295_v2 = vadd.f32 %v294_v0, %v134_v59 }
 0x109   :  { %826 = vtanh.f32 %v224_v63  ;;  %v226_v3 = vadd.f32 %v225_v1, %v130_v60  ;;  %v296_v4 = vpop.f32.mrf.mxu1 }
 0x10a   :  { %828 = vtanh.f32 %v295_v2  ;;  %v297_v5 = vadd.f32 %v296_v4, %v138_v62 }
 0x10b   :  { %830 = vtanh.f32 %v226_v3 }
 0x10c   :  { %832 = vtanh.f32 %v297_v5 }
 0x116   :  { %v827_v7 = vpop.eup %826 }
 0x117   :  { %v829_v9 = vpop.eup %828  ;;  %v365_v10 = vpop.f32.mrf.mxu0 }
 0x118   :  { %v831_v11 = vpop.eup %830  ;;  %v366_v33 = vadd.f32 %v365_v10, %v142_v28 }
 0x119   :  { %v833_v13 = vpop.eup %832  ;;  %543 = vmatprep.mubr.f32.mxu1 %v831_v11  ;;  %v367_v15 = vpop.f32.mrf.mxu0 }
 0x11a   :  { %544 = vmatmul.mubr.f32.vlgmr.msra.gmra.mxu1 %v827_v7  ;;  %613 = vmatprep.mubr.f32.mxu0 %v833_v13  ;;  %v368_v17 = vadd.f32 %v367_v15, %v146_v8 }
 0x11b   :  { %782 = vmatpush3.msra.mxu1 %v455_v12  ;;  %614 = vmatmul.mubr.f32.vlgmr.msra.gmra.mxu0 %v829_v9 }
 0x11c   :  { %783 = vmatprep.subr.mxu1 %v470_v14  ;;  %834 = vtanh.f32 %v368_v17 }
 0x11d   :  { %784 = vmatpush3.msra.mxu1 %v454_v16  ;;  %836 = vtanh.f32 %v366_v33 }
 0x11e   :  { %785 = vmatprep.subr.mxu1 %v469_v18 }
 0x11f   :  { %786 = vmatpush3.msra.mxu1 %v453_v19 }
 0x120   :  { %787 = vmatprep.subr.mxu1 %v468_v20 }
 0x121   :  { %788 = vmatpush3.msra.mxu1 %v452_v21 }
 0x122   :  { %789 = vmatprep.subr.mxu1 %v467_v22 }
 0x123   :  { %790 = vmatpush3.msra.mxu1 %v451_v23 }
 0x124   :  { %791 = vmatprep.subr.mxu1 %v466_v25 }
 0x125   :  { %792 = vmatpush3.msra.mxu1 %v450_v26 }
 0x126   :  { %793 = vmatprep.subr.mxu1 %v465_v27 }
 0x127   :  { %794 = vmatpush3.msra.mxu1 %v449_v29 }
 0x128   :  { %795 = vmatprep.subr.mxu1 %v464_v30 }
 0x129   :  { %v835_v35 = vpop.eup %834  ;;  %796 = vmatpush3.msra.mxu1 %v448_v31 }
 0x12a   :  { %797 = vmatprep.subr.mxu1 %v463_v32  ;;  %683 = vmatprep.mubr.f32.mxu1 %v835_v35  ;;  %v837_v50 = vpop.eup %836 }
 0x12b   :  { %798 = vmatpush3.msra.mxu1 %v447_v34 }
 0x12c   :  { %799 = vmatprep.subr.mxu1 %v462_v36 }
 0x12d   :  { %800 = vmatpush3.msra.mxu1 %v446_v37 }
 0x12e   :  { %801 = vmatprep.subr.mxu1 %v461_v38 }
 0x12f   :  { %802 = vmatpush3.msra.mxu1 %v445_v39 }
 0x130   :  { %803 = vmatprep.subr.mxu1 %v460_v40 }
 0x131   :  { %804 = vmatpush3.msra.mxu1 %v444_v41 }
 0x132   :  { %805 = vmatprep.subr.mxu1 %v459_v42 }
 0x133   :  { %806 = vmatpush3.msra.mxu1 %v443_v43 }
 0x134   :  { %807 = vmatprep.subr.mxu1 %v458_v44 }
 0x135   :  { %808 = vmatpush3.msra.mxu1 %v442_v45 }
 0x136   :  { %809 = vmatprep.subr.mxu1 %v457_v46 }
 0x137   :  { %810 = vmatpush3.msra.mxu1 %v441_v47 }
 0x138   :  { %811 = vmatprep.subr.mxu1 %v456_v48 }
 0x139   :  { %812 = vmatpush3.msra.mxu1 %v440_v49 }
 0x13a   :  { %684 = vmatmul.mubr.f32.vlgmr.msra.gmra.mxu1 %v837_v50 }
 0x1da   :  { %v743_v51 = vpop.f32.mrf.mxu1 }
 0x1db   :  { %v778_v53 = vpop.f32.mrf.mxu0 }
 0x1dc   :  { %v744_v52 = vpop.f32.mrf.mxu1 }
 0x1dd   :  { %v745_v54 = vadd.f32 %v744_v52, %v743_v51  ;;  %v779_v56 = vpop.f32.mrf.mxu0 }
 0x1de   :  { %v780_v58 = vadd.f32 %v779_v56, %v778_v53 }
 0x1df   :  { %v546_v57 = vadd.f32 %v745_v54, %v710_v55 }
 0x1e1   :  { %v616_v61 = vadd.f32 %v780_v58, %v546_v57 }
 0x1fa   :  { %v813_v59 = vpop.f32.mrf.mxu1 }
 0x1fc   :  { %v814_v60 = vpop.f32.mrf.mxu1 }
 0x1fd   :  { %v815_v62 = vadd.f32 %v814_v60, %v813_v59 }
 0x1ff   :  { %v686_v63 = vadd.f32 %v815_v62, %v616_v61 }
 0x201   :  { %689 = vst [vmem:[#allocation10] sm:$0xff] %v686_v63 }
 0x202   :  { %929 = shalt.err (!%p926_p10)
}
 0x203   :  { %699 = dma.vmem_to_hbm [thread:$0]  %s697_s16, 128, %s1020_s5, [#allocation4]  }
 0x204   :  { %944 = dma.done.wait [#allocation4], 128  }
 0x205   :  { %945 = vsyncadd [#allocation4], 4294967168 }
 0x206   :  { %703 = vsyncpa [#allocation3], 1 }
 0x207   :  { %704 = vsyncpa [#allocation6], 1 }
 0x208   :  { %705 = vsyncpa [#allocation9], 1 }
 0x209   :  { %706 = vsyncpa [#allocation4], 1 }

</bundles_post_ra>
